<compile_context>
chip_gen: v5e
topology: v5e:2x2
jax: 0.10.0
libtpu: 0.0.40
codegen_flags: <defaults>
</compile_context>

<pallas_src>
import numpy as np
import jax
import jax.numpy as jnp
from jax.experimental import pallas as pl
from jax.experimental.pallas import tpu as pltpu


def _round_up(x, m):
    return (x + m - 1) // m * m


def pole_agent_kernel(y0_ref, U_ref, logr_ref, logi_ref, sign_ref, Bf_ref,
                      bias_ref, Wy2x_ref, by2x_ref, Wx2y_ref, bx2y_ref,
                      out_ref, x_scr):
    BP = y0_ref.shape[0]                 # padded batch (multiple of 8)
    TB, Nu = U_ref.shape                 # TB = T * BP
    NHP = logr_ref.shape[-1]             # 2 * nh2_pad (halves packed on lanes)
    NH2P = NHP // 2
    T = TB // BP

    # ---- pole parameterization (elementwise, once; halves pre-duplicated on lanes) ----
    lg_r = logr_ref[...]                                   # (1, NHP)
    lg_i = logi_ref[...]                                   # (1, NHP)
    r = jnp.exp(-jnp.exp(-jnp.abs(lg_r)))
    theta = (np.pi / 2.0) * jnp.exp(-jnp.abs(lg_i))
    lr_full = r * jnp.cos(theta)                           # [ lr | lr ]
    li_signed = sign_ref[...] * (r * jnp.sin(theta))       # [ -li | li ]
    norm_full = jnp.sqrt(1.0 - jnp.exp(-2.0 * jnp.exp(-jnp.abs(lg_r))))

    # Hoist broadcasts out of the recurrence (JAX does not CSE broadcast_in_dim).
    lr_b = jnp.broadcast_to(lr_full, (BP, NHP))
    li_b = jnp.broadcast_to(li_signed, (BP, NHP))

    # ---- initial state x0 = y2x(y0): one small MXU matmul on padded tiles ----
    x = (jnp.dot(y0_ref[...], Wy2x_ref[...], preferred_element_type=jnp.float32)
         + by2x_ref[...])                                  # (BP, NHP)
    x_scr[pl.ds(0, BP), :] = x

    # ---- hoisted input projection for ALL steps (VPU outer products, Nu tiny),
    #      norm factor + bias folded once, parked in scratch rows k+1 so the live
    #      range stays in VMEM rather than vregs ----
    U = U_ref[...]                                         # (T*BP, Nu)
    Bf = Bf_ref[...]                                       # (Nu, NHP)
    c = U[:, 0:1] * Bf[0:1, :]
    for j in range(1, Nu):                                 # static, tiny
        c = c + U[:, j:j + 1] * Bf[j:j + 1, :]
    c = c * norm_full + bias_ref[...]                      # (T*BP, NHP)
    x_scr[pl.ds(BP, TB), :] = c
    # TODO(synk): for large T*B compute c per T-chunk inside the recurrence instead of
    # one bulk pass, to bound vreg pressure and enable streamed (grid-chunked) U.

    # ---- recurrence (fully unrolled, T static & small): packed-halves VPU FMAs,
    #      cross term via an XLU lane roll; all slices are aligned (8, 128k) tiles ----
    for k in range(T):
        off = (k + 1) * BP
        ck = x_scr[pl.ds(off, BP), :]                      # pre-filled norm*Bu_k + bias
        x = x * lr_b + pltpu.roll(x, NH2P, axis=1) * li_b + ck
        x_scr[pl.ds(off, BP), :] = x
    # TODO(synk): for long horizons replace this serial loop with a chunked associative
    # scan (A is a diagonal complex rotation) plus T-chunked / batch-parallel grid axes.

    # ---- output projection: one MXU matmul, single lane-dense bulk store ----
    out_ref[...] = (jnp.dot(x_scr[...], Wx2y_ref[...], preferred_element_type=jnp.float32)
                    + bx2y_ref[...])


def pole_agent_forward(y0, U, params):
    """y0: (B, Ny) f32, U: (T, B, Nu) f32 -> Y: (T+1, B, Ny) f32."""
    T, Bsz, Nu = U.shape
    Ny = y0.shape[1]
    Nh = params["B"].shape[0]
    nh2 = Nh // 2

    BP = _round_up(Bsz, 8)          # sublane-aligned batch
    NH2P = _round_up(nh2, 128)      # lane-aligned half state
    NHP = 2 * NH2P
    NYP = _round_up(Ny, 128)        # lane-dense output features

    f32 = jnp.float32

    def pad_to(a, shape):
        a = a.astype(f32)
        return jnp.pad(a, [(0, s - d) for d, s in zip(a.shape, shape)])

    def fuse_halves(a1, a2, rows):
        # two (r, nh2) halves -> (rows, NHP) with each half zero-padded to NH2P lanes
        return jnp.concatenate([pad_to(a1, (rows, NH2P)), pad_to(a2, (rows, NH2P))],
                               axis=1)

    logr = params["log_real"].reshape(1, nh2)
    logi = params["log_imag"].reshape(1, nh2)
    Bm = params["B"]                # (Nh, Nu)
    bias = params["bias"]           # (Nh,)
    Wy2x = params["W_y2x"]          # (Nh, Ny)
    by2x = params["b_y2x"]          # (Nh,)
    Wx2y = params["W_x2y"]          # (Ny, Nh)
    bx2y = params["b_x2y"]          # (Ny,)

    # Plain-JAX glue (free at XLA level): pad / fuse halves so the kernel never
    # concatenates, and so all its tiles are (8,128)-aligned.
    logr2 = fuse_halves(logr, logr, 1)                              # (1, NHP)
    logi2 = fuse_halves(logi, logi, 1)                              # (1, NHP)
    sign = jnp.concatenate([-jnp.ones((1, NH2P), f32),
                            jnp.ones((1, NH2P), f32)], axis=1)      # (1, NHP)

    Bf = fuse_halves(Bm[:nh2].T, Bm[nh2:].T, Nu)                    # (Nu, NHP)
    bias_f = fuse_halves(bias[:nh2].reshape(1, nh2),
                         bias[nh2:].reshape(1, nh2), 1)             # (1, NHP)
    Wy2xT = Wy2x.T                                                  # (Ny, Nh)
    Wy2x_f = fuse_halves(Wy2xT[:, :nh2], Wy2xT[:, nh2:], NYP)       # (NYP, NHP)
    by2x_f = fuse_halves(by2x[:nh2].reshape(1, nh2),
                         by2x[nh2:].reshape(1, nh2), 1)             # (1, NHP)
    Wx2yT = Wx2y.T                                                  # (Nh, Ny)
    Wx2y_f = jnp.concatenate([pad_to(Wx2yT[:nh2], (NH2P, NYP)),
                              pad_to(Wx2yT[nh2:], (NH2P, NYP))], axis=0)  # (NHP, NYP)
    bx2y_f = pad_to(bx2y.reshape(1, Ny), (1, NYP))                  # (1, NYP)

    y0_p = pad_to(y0, (BP, NYP))                                    # (BP, NYP)
    U_p = jnp.pad(U.astype(f32),
                  ((0, 0), (0, BP - Bsz), (0, 0))).reshape(T * BP, Nu)

    ins = (y0_p, U_p, logr2, logi2, sign, Bf, bias_f, Wy2x_f, by2x_f, Wx2y_f, bx2y_f)

    vmem = pl.BlockSpec(memory_space=pltpu.MemorySpace.VMEM)
    y2d = pl.pallas_call(
        pole_agent_kernel,
        out_shape=jax.ShapeDtypeStruct(((T + 1) * BP, NYP), f32),
        in_specs=[vmem] * len(ins),
        out_specs=vmem,
        scratch_shapes=[pltpu.VMEM(((T + 1) * BP, NHP), f32)],
    )(*ins)
    # Strip padding outside the kernel (cheap XLA slice).
    return y2d.reshape(T + 1, BP, NYP)[:, :Bsz, :Ny]


def ref_forward(y0, U, params):
    """Pure-JAX reference mirroring the torch code exactly."""
    lr_log = params["log_real"]
    li_log = params["log_imag"]
    r = jnp.exp(-jnp.exp(-jnp.abs(lr_log)))
    theta = (np.pi / 2.0) * jnp.exp(-jnp.abs(li_log))
    lr = r * jnp.cos(theta)
    li = r * jnp.sin(theta)
    A11 = jnp.diag(lr)
    A21 = jnp.diag(li)
    A = jnp.concatenate(
        [jnp.concatenate([A11, -A21], axis=1), jnp.concatenate([A21, A11], axis=1)],
        axis=0,
    )
    nf_tmp = jnp.sqrt(1.0 - jnp.exp(-2.0 * jnp.exp(-jnp.abs(lr_log))))
    nf = jnp.concatenate([nf_tmp, nf_tmp])
    Bu = jnp.matmul(U, params["B"].T) * nf              # (T, B, Nh)
    x = jnp.matmul(y0, params["W_y2x"].T) + params["b_y2x"]
    X = [x]
    for k in range(U.shape[0]):
        x = jnp.matmul(x, A.T) + Bu[k] + params["bias"]
        X.append(x)
    Xs = jnp.stack(X, axis=0)
    return jnp.matmul(Xs, params["W_x2y"].T) + params["b_x2y"]


if __name__ == "__main__":
    # Small shapes consistent with the module.
    Ny, Nu, Nhidden = 4, 2, 32
    Nhrz, Bsz = 8, 2
    damping = 0.9

    key = jax.random.PRNGKey(0)
    k = jax.random.split(key, 8)

    params = {
        # -log(-log(damping)) * ones(Nh/2)
        "log_real": jnp.full((Nhidden // 2,), -np.log(-np.log(damping)), dtype=jnp.float32),
        # np.random.rand(Nh/2) -> uniform [0,1)
        "log_imag": jax.random.uniform(k[0], (Nhidden // 2,), dtype=jnp.float32),
        # randn(Nh, Nu)/sqrt(Nu)
        "B": jax.random.normal(k[1], (Nhidden, Nu), dtype=jnp.float32) / np.sqrt(Nu),
        "bias": jnp.zeros((Nhidden,), dtype=jnp.float32),
        # nn.Linear(Ny, Nhidden): weight (Nh, Ny), bias (Nh,)
        "W_y2x": jax.random.uniform(k[2], (Nhidden, Ny), dtype=jnp.float32,
                                    minval=-1.0 / np.sqrt(Ny), maxval=1.0 / np.sqrt(Ny)),
        "b_y2x": jax.random.uniform(k[3], (Nhidden,), dtype=jnp.float32,
                                    minval=-1.0 / np.sqrt(Ny), maxval=1.0 / np.sqrt(Ny)),
        # nn.Linear(Nhidden, Ny): weight (Ny, Nh), bias (Ny,)
        "W_x2y": jax.random.uniform(k[4], (Ny, Nhidden), dtype=jnp.float32,
                                    minval=-1.0 / np.sqrt(Nhidden), maxval=1.0 / np.sqrt(Nhidden)),
        "b_x2y": jax.random.uniform(k[5], (Ny,), dtype=jnp.float32,
                                    minval=-1.0 / np.sqrt(Nhidden), maxval=1.0 / np.sqrt(Nhidden)),
    }

    y0 = jax.random.normal(k[6], (Bsz, Ny), dtype=jnp.float32)
    U = jax.random.normal(k[7], (Nhrz, Bsz, Nu), dtype=jnp.float32)

    Y = pole_agent_forward(y0, U, params)
    Y = jax.block_until_ready(Y)

    Y_ref = ref_forward(y0, U, params)
    assert Y.shape == (Nhrz + 1, Bsz, Ny)
    np.testing.assert_allclose(np.asarray(Y), np.asarray(Y_ref), rtol=1e-5, atol=1e-5)

    print("KERNEL_OK")
</pallas_src>

<mosaic_0001>
module attributes {stable_mosaic.version = 11 : i64} {
  func.func @pole_agent_kernel(%arg0: memref<8x128xf32, #tpu.memory_space<vmem>>, %arg1: memref<64x2xf32, #tpu.memory_space<vmem>>, %arg2: memref<1x256xf32, #tpu.memory_space<vmem>>, %arg3: memref<1x256xf32, #tpu.memory_space<vmem>>, %arg4: memref<1x256xf32, #tpu.memory_space<vmem>>, %arg5: memref<2x256xf32, #tpu.memory_space<vmem>>, %arg6: memref<1x256xf32, #tpu.memory_space<vmem>>, %arg7: memref<128x256xf32, #tpu.memory_space<vmem>>, %arg8: memref<1x256xf32, #tpu.memory_space<vmem>>, %arg9: memref<256x128xf32, #tpu.memory_space<vmem>>, %arg10: memref<1x128xf32, #tpu.memory_space<vmem>>, %arg11: memref<72x128xf32, #tpu.memory_space<vmem>>, %arg12: memref<72x256xf32, #tpu.memory_space<vmem>>) attributes {dimension_semantics = [], scalar_prefetch = 0 : i64, scratch_operands = 1 : i64, tpu.core_type = #tpu.core_type<tc>} {
    %c0 = arith.constant 0 : index
    %c0_0 = arith.constant 0 : index
    %0 = vector.load %arg2[%c0, %c0_0] : memref<1x256xf32, #tpu.memory_space<vmem>>, vector<1x256xf32>
    %c0_1 = arith.constant 0 : index
    %c0_2 = arith.constant 0 : index
    %1 = vector.load %arg3[%c0_1, %c0_2] : memref<1x256xf32, #tpu.memory_space<vmem>>, vector<1x256xf32>
    %2 = math.absf %0 : vector<1x256xf32>
    %cst = arith.constant 0.000000e+00 : f32
    %3 = vector.broadcast %cst : f32 to vector<1x256xf32>
    %4 = arith.subf %3, %2 : vector<1x256xf32>
    %5 = math.exp %4 : vector<1x256xf32>
    %cst_3 = arith.constant 0.000000e+00 : f32
    %6 = vector.broadcast %cst_3 : f32 to vector<1x256xf32>
    %7 = arith.subf %6, %5 : vector<1x256xf32>
    %8 = math.exp %7 : vector<1x256xf32>
    %9 = math.absf %1 : vector<1x256xf32>
    %cst_4 = arith.constant 0.000000e+00 : f32
    %10 = vector.broadcast %cst_4 : f32 to vector<1x256xf32>
    %11 = arith.subf %10, %9 : vector<1x256xf32>
    %12 = math.exp %11 : vector<1x256xf32>
    %cst_5 = arith.constant 1.57079637 : f32
    %13 = vector.broadcast %cst_5 : f32 to vector<1x256xf32>
    %14 = arith.mulf %13, %12 : vector<1x256xf32>
    %15 = math.cos %14 : vector<1x256xf32>
    %16 = arith.mulf %8, %15 : vector<1x256xf32>
    %c0_6 = arith.constant 0 : index
    %c0_7 = arith.constant 0 : index
    %17 = vector.load %arg4[%c0_6, %c0_7] : memref<1x256xf32, #tpu.memory_space<vmem>>, vector<1x256xf32>
    %18 = math.sin %14 : vector<1x256xf32>
    %19 = arith.mulf %8, %18 : vector<1x256xf32>
    %20 = arith.mulf %17, %19 : vector<1x256xf32>
    %21 = math.absf %0 : vector<1x256xf32>
    %cst_8 = arith.constant 0.000000e+00 : f32
    %22 = vector.broadcast %cst_8 : f32 to vector<1x256xf32>
    %23 = arith.subf %22, %21 : vector<1x256xf32>
    %24 = math.exp %23 : vector<1x256xf32>
    %cst_9 = arith.constant -2.000000e+00 : f32
    %25 = vector.broadcast %cst_9 : f32 to vector<1x256xf32>
    %26 = arith.mulf %25, %24 : vector<1x256xf32>
    %27 = math.exp %26 : vector<1x256xf32>
    %cst_10 = arith.constant 1.000000e+00 : f32
    %28 = vector.broadcast %cst_10 : f32 to vector<1x256xf32>
    %29 = arith.subf %28, %27 : vector<1x256xf32>
    %30 = math.sqrt %29 : vector<1x256xf32>
    %31 = vector.shape_cast %16 : vector<1x256xf32> to vector<1x256xf32>
    %32 = vector.broadcast %31 : vector<1x256xf32> to vector<8x256xf32>
    %33 = vector.shape_cast %20 : vector<1x256xf32> to vector<1x256xf32>
    %34 = vector.broadcast %33 : vector<1x256xf32> to vector<8x256xf32>
    %c0_11 = arith.constant 0 : index
    %c0_12 = arith.constant 0 : index
    %35 = vector.load %arg0[%c0_11, %c0_12] : memref<8x128xf32, #tpu.memory_space<vmem>>, vector<8x128xf32>
    %c0_13 = arith.constant 0 : index
    %c0_14 = arith.constant 0 : index
    %36 = vector.load %arg7[%c0_13, %c0_14] : memref<128x256xf32, #tpu.memory_space<vmem>>, vector<128x256xf32>
    %cst_15 = arith.constant dense<0.000000e+00> : vector<8x256xf32>
    %37 = tpu.matmul %35, %36, %cst_15 {dimension_numbers = #tpu.dot_dimension_numbers<[1], [0], [0], [1], [0, 0, 1, 1], [], []>} : vector<8x128xf32>, vector<128x256xf32>, vector<8x256xf32> -> vector<8x256xf32>
    %c0_16 = arith.constant 0 : index
    %c0_17 = arith.constant 0 : index
    %38 = vector.load %arg8[%c0_16, %c0_17] : memref<1x256xf32, #tpu.memory_space<vmem>>, vector<1x256xf32>
    %39 = vector.broadcast %38 : vector<1x256xf32> to vector<8x256xf32>
    %40 = arith.addf %37, %39 : vector<8x256xf32>
    %c0_18 = arith.constant 0 : index
    %c0_19 = arith.constant 0 : index
    %41 = vector.load %arg12[%c0_18, %c0_19] : memref<72x256xf32, #tpu.memory_space<vmem>>, vector<8x256xf32>
    tpu.vector_store %arg12[%c0_18, %c0_19], %40 {strides = array<i32>} : memref<72x256xf32, #tpu.memory_space<vmem>>, vector<8x256xf32>,
    %c0_20 = arith.constant 0 : index
    %c0_21 = arith.constant 0 : index
    %42 = vector.load %arg1[%c0_20, %c0_21] : memref<64x2xf32, #tpu.memory_space<vmem>>, vector<64x2xf32>
    %c0_22 = arith.constant 0 : index
    %c0_23 = arith.constant 0 : index
    %43 = vector.load %arg5[%c0_22, %c0_23] : memref<2x256xf32, #tpu.memory_space<vmem>>, vector<2x256xf32>
    %44 = vector.extract_strided_slice %42 {offsets = [0, 0], sizes = [64, 1], strides = [1, 1]} : vector<64x2xf32> to vector<64x1xf32>
    %45 = vector.extract_strided_slice %43 {offsets = [0, 0], sizes = [1, 256], strides = [1, 1]} : vector<2x256xf32> to vector<1x256xf32>
    %46 = vector.broadcast %44 : vector<64x1xf32> to vector<64x256xf32>
    %47 = vector.broadcast %45 : vector<1x256xf32> to vector<64x256xf32>
    %48 = arith.mulf %46, %47 : vector<64x256xf32>
    %49 = vector.extract_strided_slice %42 {offsets = [0, 1], sizes = [64, 1], strides = [1, 1]} : vector<64x2xf32> to vector<64x1xf32>
    %50 = vector.extract_strided_slice %43 {offsets = [1, 0], sizes = [1, 256], strides = [1, 1]} : vector<2x256xf32> to vector<1x256xf32>
    %51 = vector.broadcast %49 : vector<64x1xf32> to vector<64x256xf32>
    %52 = vector.broadcast %50 : vector<1x256xf32> to vector<64x256xf32>
    %53 = arith.mulf %51, %52 : vector<64x256xf32>
    %54 = arith.addf %48, %53 : vector<64x256xf32>
    %55 = vector.broadcast %30 : vector<1x256xf32> to vector<64x256xf32>
    %56 = arith.mulf %54, %55 : vector<64x256xf32>
    %c0_24 = arith.constant 0 : index
    %c0_25 = arith.constant 0 : index
    %57 = vector.load %arg6[%c0_24, %c0_25] : memref<1x256xf32, #tpu.memory_space<vmem>>, vector<1x256xf32>
    %58 = vector.broadcast %57 : vector<1x256xf32> to vector<64x256xf32>
    %59 = arith.addf %56, %58 : vector<64x256xf32>
    %c8 = arith.constant 8 : index
    %c0_26 = arith.constant 0 : index
    %60 = vector.load %arg12[%c8, %c0_26] : memref<72x256xf32, #tpu.memory_space<vmem>>, vector<64x256xf32>
    tpu.vector_store %arg12[%c8, %c0_26], %59 {strides = array<i32>} : memref<72x256xf32, #tpu.memory_space<vmem>>, vector<64x256xf32>,
    %c8_27 = arith.constant 8 : index
    %c0_28 = arith.constant 0 : index
    %61 = vector.load %arg12[%c8_27, %c0_28] : memref<72x256xf32, #tpu.memory_space<vmem>>, vector<8x256xf32>
    %62 = arith.mulf %40, %32 : vector<8x256xf32>
    %c128_i32 = arith.constant 128 : i32
    %63 = tpu.dynamic_rotate %40 by %c128_i32 dim 1 : vector<8x256xf32>, i32 -> vector<8x256xf32>
    %64 = arith.mulf %63, %34 : vector<8x256xf32>
    %65 = arith.addf %62, %64 : vector<8x256xf32>
    %66 = arith.addf %65, %61 : vector<8x256xf32>
    %c8_29 = arith.constant 8 : index
    %c0_30 = arith.constant 0 : index
    %67 = vector.load %arg12[%c8_29, %c0_30] : memref<72x256xf32, #tpu.memory_space<vmem>>, vector<8x256xf32>
    tpu.vector_store %arg12[%c8_29, %c0_30], %66 {strides = array<i32>} : memref<72x256xf32, #tpu.memory_space<vmem>>, vector<8x256xf32>,
    %c16 = arith.constant 16 : index
    %c0_31 = arith.constant 0 : index
    %68 = vector.load %arg12[%c16, %c0_31] : memref<72x256xf32, #tpu.memory_space<vmem>>, vector<8x256xf32>
    %69 = arith.mulf %66, %32 : vector<8x256xf32>
    %c128_i32_32 = arith.constant 128 : i32
    %70 = tpu.dynamic_rotate %66 by %c128_i32_32 dim 1 : vector<8x256xf32>, i32 -> vector<8x256xf32>
    %71 = arith.mulf %70, %34 : vector<8x256xf32>
    %72 = arith.addf %69, %71 : vector<8x256xf32>
    %73 = arith.addf %72, %68 : vector<8x256xf32>
    %c16_33 = arith.constant 16 : index
    %c0_34 = arith.constant 0 : index
    %74 = vector.load %arg12[%c16_33, %c0_34] : memref<72x256xf32, #tpu.memory_space<vmem>>, vector<8x256xf32>
    tpu.vector_store %arg12[%c16_33, %c0_34], %73 {strides = array<i32>} : memref<72x256xf32, #tpu.memory_space<vmem>>, vector<8x256xf32>,
    %c24 = arith.constant 24 : index
    %c0_35 = arith.constant 0 : index
    %75 = vector.load %arg12[%c24, %c0_35] : memref<72x256xf32, #tpu.memory_space<vmem>>, vector<8x256xf32>
    %76 = arith.mulf %73, %32 : vector<8x256xf32>
    %c128_i32_36 = arith.constant 128 : i32
    %77 = tpu.dynamic_rotate %73 by %c128_i32_36 dim 1 : vector<8x256xf32>, i32 -> vector<8x256xf32>
    %78 = arith.mulf %77, %34 : vector<8x256xf32>
    %79 = arith.addf %76, %78 : vector<8x256xf32>
    %80 = arith.addf %79, %75 : vector<8x256xf32>
    %c24_37 = arith.constant 24 : index
    %c0_38 = arith.constant 0 : index
    %81 = vector.load %arg12[%c24_37, %c0_38] : memref<72x256xf32, #tpu.memory_space<vmem>>, vector<8x256xf32>
    tpu.vector_store %arg12[%c24_37, %c0_38], %80 {strides = array<i32>} : memref<72x256xf32, #tpu.memory_space<vmem>>, vector<8x256xf32>,
    %c32 = arith.constant 32 : index
    %c0_39 = arith.constant 0 : index
    %82 = vector.load %arg12[%c32, %c0_39] : memref<72x256xf32, #tpu.memory_space<vmem>>, vector<8x256xf32>
    %83 = arith.mulf %80, %32 : vector<8x256xf32>
    %c128_i32_40 = arith.constant 128 : i32
    %84 = tpu.dynamic_rotate %80 by %c128_i32_40 dim 1 : vector<8x256xf32>, i32 -> vector<8x256xf32>
    %85 = arith.mulf %84, %34 : vector<8x256xf32>
    %86 = arith.addf %83, %85 : vector<8x256xf32>
    %87 = arith.addf %86, %82 : vector<8x256xf32>
    %c32_41 = arith.constant 32 : index
    %c0_42 = arith.constant 0 : index
    %88 = vector.load %arg12[%c32_41, %c0_42] : memref<72x256xf32, #tpu.memory_space<vmem>>, vector<8x256xf32>
    tpu.vector_store %arg12[%c32_41, %c0_42], %87 {strides = array<i32>} : memref<72x256xf32, #tpu.memory_space<vmem>>, vector<8x256xf32>,
    %c40 = arith.constant 40 : index
    %c0_43 = arith.constant 0 : index
    %89 = vector.load %arg12[%c40, %c0_43] : memref<72x256xf32, #tpu.memory_space<vmem>>, vector<8x256xf32>
    %90 = arith.mulf %87, %32 : vector<8x256xf32>
    %c128_i32_44 = arith.constant 128 : i32
    %91 = tpu.dynamic_rotate %87 by %c128_i32_44 dim 1 : vector<8x256xf32>, i32 -> vector<8x256xf32>
    %92 = arith.mulf %91, %34 : vector<8x256xf32>
    %93 = arith.addf %90, %92 : vector<8x256xf32>
    %94 = arith.addf %93, %89 : vector<8x256xf32>
    %c40_45 = arith.constant 40 : index
    %c0_46 = arith.constant 0 : index
    %95 = vector.load %arg12[%c40_45, %c0_46] : memref<72x256xf32, #tpu.memory_space<vmem>>, vector<8x256xf32>
    tpu.vector_store %arg12[%c40_45, %c0_46], %94 {strides = array<i32>} : memref<72x256xf32, #tpu.memory_space<vmem>>, vector<8x256xf32>,
    %c48 = arith.constant 48 : index
    %c0_47 = arith.constant 0 : index
    %96 = vector.load %arg12[%c48, %c0_47] : memref<72x256xf32, #tpu.memory_space<vmem>>, vector<8x256xf32>
    %97 = arith.mulf %94, %32 : vector<8x256xf32>
    %c128_i32_48 = arith.constant 128 : i32
    %98 = tpu.dynamic_rotate %94 by %c128_i32_48 dim 1 : vector<8x256xf32>, i32 -> vector<8x256xf32>
    %99 = arith.mulf %98, %34 : vector<8x256xf32>
    %100 = arith.addf %97, %99 : vector<8x256xf32>
    %101 = arith.addf %100, %96 : vector<8x256xf32>
    %c48_49 = arith.constant 48 : index
    %c0_50 = arith.constant 0 : index
    %102 = vector.load %arg12[%c48_49, %c0_50] : memref<72x256xf32, #tpu.memory_space<vmem>>, vector<8x256xf32>
    tpu.vector_store %arg12[%c48_49, %c0_50], %101 {strides = array<i32>} : memref<72x256xf32, #tpu.memory_space<vmem>>, vector<8x256xf32>,
    %c56 = arith.constant 56 : index
    %c0_51 = arith.constant 0 : index
    %103 = vector.load %arg12[%c56, %c0_51] : memref<72x256xf32, #tpu.memory_space<vmem>>, vector<8x256xf32>
    %104 = arith.mulf %101, %32 : vector<8x256xf32>
    %c128_i32_52 = arith.constant 128 : i32
    %105 = tpu.dynamic_rotate %101 by %c128_i32_52 dim 1 : vector<8x256xf32>, i32 -> vector<8x256xf32>
    %106 = arith.mulf %105, %34 : vector<8x256xf32>
    %107 = arith.addf %104, %106 : vector<8x256xf32>
    %108 = arith.addf %107, %103 : vector<8x256xf32>
    %c56_53 = arith.constant 56 : index
    %c0_54 = arith.constant 0 : index
    %109 = vector.load %arg12[%c56_53, %c0_54] : memref<72x256xf32, #tpu.memory_space<vmem>>, vector<8x256xf32>
    tpu.vector_store %arg12[%c56_53, %c0_54], %108 {strides = array<i32>} : memref<72x256xf32, #tpu.memory_space<vmem>>, vector<8x256xf32>,
    %c64 = arith.constant 64 : index
    %c0_55 = arith.constant 0 : index
    %110 = vector.load %arg12[%c64, %c0_55] : memref<72x256xf32, #tpu.memory_space<vmem>>, vector<8x256xf32>
    %111 = arith.mulf %108, %32 : vector<8x256xf32>
    %c128_i32_56 = arith.constant 128 : i32
    %112 = tpu.dynamic_rotate %108 by %c128_i32_56 dim 1 : vector<8x256xf32>, i32 -> vector<8x256xf32>
    %113 = arith.mulf %112, %34 : vector<8x256xf32>
    %114 = arith.addf %111, %113 : vector<8x256xf32>
    %115 = arith.addf %114, %110 : vector<8x256xf32>
    %c64_57 = arith.constant 64 : index
    %c0_58 = arith.constant 0 : index
    %116 = vector.load %arg12[%c64_57, %c0_58] : memref<72x256xf32, #tpu.memory_space<vmem>>, vector<8x256xf32>
    tpu.vector_store %arg12[%c64_57, %c0_58], %115 {strides = array<i32>} : memref<72x256xf32, #tpu.memory_space<vmem>>, vector<8x256xf32>,
    %c0_59 = arith.constant 0 : index
    %c0_60 = arith.constant 0 : index
    %117 = vector.load %arg12[%c0_59, %c0_60] : memref<72x256xf32, #tpu.memory_space<vmem>>, vector<72x256xf32>
    %c0_61 = arith.constant 0 : index
    %c0_62 = arith.constant 0 : index
    %118 = vector.load %arg9[%c0_61, %c0_62] : memref<256x128xf32, #tpu.memory_space<vmem>>, vector<256x128xf32>
    %cst_63 = arith.constant dense<0.000000e+00> : vector<72x128xf32>
    %119 = tpu.matmul %117, %118, %cst_63 {dimension_numbers = #tpu.dot_dimension_numbers<[1], [0], [0], [1], [0, 0, 1, 1], [], []>} : vector<72x256xf32>, vector<256x128xf32>, vector<72x128xf32> -> vector<72x128xf32>
    %c0_64 = arith.constant 0 : index
    %c0_65 = arith.constant 0 : index
    %120 = vector.load %arg10[%c0_64, %c0_65] : memref<1x128xf32, #tpu.memory_space<vmem>>, vector<1x128xf32>
    %121 = vector.broadcast %120 : vector<1x128xf32> to vector<72x128xf32>
    %122 = arith.addf %119, %121 : vector<72x128xf32>
    %c0_66 = arith.constant 0 : index
    %c0_67 = arith.constant 0 : index
    %123 = vector.load %arg11[%c0_66, %c0_67] : memref<72x128xf32, #tpu.memory_space<vmem>>, vector<72x128xf32>
    tpu.vector_store %arg11[%c0_66, %c0_67], %122 {strides = array<i32>} : memref<72x128xf32, #tpu.memory_space<vmem>>, vector<72x128xf32>,
    return
  }
}

</mosaic_0001>

<bundles_post_ra>
// kernel: tpu_custom_call.1
= control target key start
LH: loop header
LB: loop body
LE: loop exit
PB: predicated region body
PF: predicated region fallthrough
CT: control target
= control target key end

     0   :  { %16 = vsyncpa [#allocation4], 0  ;;  %s1497_s0 = inlined_call_operand.vmem [shape: f32[8,128], index: 0, kind: input, shape index: {}]   ;;  %s1498_s1 = inlined_call_operand.vmem [shape: f32[64,2], index: 1, kind: input, shape index: {}]   ;;  %s1499_s2 = inlined_call_operand.vmem [shape: f32[1,256], index: 2, kind: input, shape index: {}]   ;;  %s1500_s3 = inlined_call_operand.vmem [shape: f32[1,256], index: 3, kind: input, shape index: {}]   ;;  %s1501_s4 = inlined_call_operand.vmem [shape: f32[1,256], index: 4, kind: input, shape index: {}]   ;;  %s1502_s5 = inlined_call_operand.vmem [shape: f32[2,256], index: 5, kind: input, shape index: {}]   ;;  %s1503_s6 = inlined_call_operand.vmem [shape: f32[1,256], index: 6, kind: input, shape index: {}]   ;;  %s1504_s7 = inlined_call_operand.hbm [shape: f32[128,256], index: 7, kind: input, shape index: {}]   ;;  %s1505_s8 = inlined_call_operand.vmem [shape: f32[1,256], index: 8, kind: input, shape index: {}]   ;;  %s1506_s9 = inlined_call_operand.hbm [shape: f32[256,128], index: 9, kind: input, shape index: {}]   ;;  %s1507_s10 = inlined_call_operand.vmem [shape: f32[1,128], index: 10, kind: input, shape index: {}]   ;;  %s1508_s11 = inlined_call_operand.hbm [shape: f32[72,128], index: 11, kind: output, shape index: {}]  }
   0x1   :  { %17 = vsyncpa [#allocation7], 0 }
   0x2   :  { %18 = vsyncpa [#allocation5], 0  ;;  %s37_s19 = sshll.u32 %s1504_s7, 4  ;;  %s1128_s20 = smov [#allocation3]   ;;  %s38_s19 = int_to_ptr.hbm [resolvable:$true] %s37_s19 }
   0x3   :  { %s39_s21 = sshll.u32 %s1128_s20, 4  ;;  %s52_s24 = sshll.u32 %s1506_s9, 4  ;;  %s40_s21 = int_to_ptr.vmem [resolvable:$true] %s39_s21  ;;  %s53_s24 = int_to_ptr.hbm [resolvable:$true] %s52_s24 }
   0x4   :  { %s1129_s25 = smov 256   ;;  %s1130_s26 = smov 16  }
   0x5   :  { %45 = dma.hbm_to_vmem [thread:$0]  %s38_s19, 4096, %s40_s21, [#allocation4], %s1129_s25, %s1129_s25, %s1130_s26  }
   0x6   :  { %s1131_s27 = smov [#allocation6]   ;;  %s1132_s29 = smov 128  }
   0x7   :  { %s54_s28 = sshll.u32 %s1131_s27, 4  ;;  %s1133_s30 = smov 8   ;;  %s55_s28 = int_to_ptr.vmem [resolvable:$true] %s54_s28 }
   0x8   :  { %60 = dma.hbm_to_vmem [thread:$0]  %s53_s24, 4096, %s55_s28, [#allocation7], %s1132_s29, %s1132_s29, %s1133_s30  }
   0x9   :  { %1122 = dma.done.wait [#allocation4], 4096  }
   0xa   :  { %1123 = vsyncadd [#allocation4], 4294963200 }
   0xb   :  { %1124 = dma.done.wait [#allocation7], 4096  }
   0xc   :  { %1125 = vsyncadd [#allocation7], 4294963200  ;;  %v1134_v0 = vmov 0   ;;  %v455_v1 = vld [vmem:[#allocation3 + $0xf0] sm:$0xff]  ;;  %v456_v2 = vld [vmem:[#allocation3 + $0xf8] sm:$0xff]  ;;  %v1135_v26 = vmov 1  }
   0xd   :  { %1026 = vset.pattern.permute.xlu0 %v1134_v0  ;;  %1028 = vset.pattern.permute.xlu1 %v1134_v0  ;;  %v453_v3 = vld [vmem:[#allocation3 + $0xe0] sm:$0xff]  ;;  %v454_v4 = vld [vmem:[#allocation3 + $0xe8] sm:$0xff]  ;;  %v451_v5 = vld [vmem:[#allocation3 + $0xd0] sm:$0xff] }
   0xe   :  { %1030 = vset.pattern.permute.xlu2 %v1134_v0  ;;  %463 = vmatpush.msra.mxu0 %v455_v1  ;;  %v452_v6 = vld [vmem:[#allocation3 + $0xd8] sm:$0xff]  ;;  %v449_v7 = vld [vmem:[#allocation3 + $0xc0] sm:$0xff]  ;;  %v450_v8 = vld [vmem:[#allocation3 + $0xc8] sm:$0xff] }
   0xf   :  { %483 = vmatpush.msra.mxu1 %v456_v2  ;;  %v447_v9 = vld [vmem:[#allocation3 + $0xb0] sm:$0xff]  ;;  %v448_v10 = vld [vmem:[#allocation3 + $0xb8] sm:$0xff]  ;;  %v505_v11 = vld [vmem:[%s1498_s1] sm:$0xff] }
  0x10   :  { %464 = vmatpush.msra.mxu0 %v453_v3  ;;  %v445_v12 = vld [vmem:[#allocation3 + $0xa0] sm:$0xff]  ;;  %v446_v13 = vld [vmem:[#allocation3 + $0xa8] sm:$0xff]  ;;  %516 = vperm.xlu0 %1026, %v505_v11   ;;  %v443_v15 = vld [vmem:[#allocation3 + $0x90] sm:$0xff] }
  0x11   :  { %484 = vmatpush.msra.mxu1 %v454_v4  ;;  %v506_v14 = vld [vmem:[%s1498_s1 + $0x8] sm:$0xff]  ;;  %v444_v16 = vld [vmem:[#allocation3 + $0x98] sm:$0xff]  ;;  %v441_v17 = vld [vmem:[#allocation3 + $0x80] sm:$0xff] }
  0x12   :  { %465 = vmatpush.msra.mxu0 %v451_v5  ;;  %521 = vperm.xlu1 %1028, %v506_v14   ;;  %v442_v18 = vld [vmem:[#allocation3 + $0x88] sm:$0xff]  ;;  %v507_v19 = vld [vmem:[%s1498_s1 + $0x10] sm:$0xff]  ;;  %v72_v20 = vld [vmem:[%s1500_s3] sm:$0x3]  ;;  %v1136_v5 = vmov 683565275  }
  0x13   :  { %485 = vmatpush.msra.mxu1 %v452_v6  ;;  %v439_v21 = vld [vmem:[#allocation3 + $0x70] sm:$0xff]  ;;  %v440_v22 = vld [vmem:[#allocation3 + $0x78] sm:$0xff]  ;;  %526 = vperm.xlu2 %1030, %v507_v19   ;;  %v80_v23 = vand.u32 2147483647, %v72_v20  ;;  %v437_v24 = vld [vmem:[#allocation3 + $0x60] sm:$0xff]  ;;  %s959_s3 = sshll.u32 %s1508_s11, 4  ;;  %s960_s3 = int_to_ptr.hbm [resolvable:$true] %s959_s3 }
  0x14   :  { %466 = vmatpush.msra.mxu0 %v449_v7  ;;  %v438_v25 = vld [vmem:[#allocation3 + $0x68] sm:$0xff]  ;;  %v435_v28 = vld [vmem:[#allocation3 + $0x50] sm:$0xff]  ;;  %v436_v29 = vld [vmem:[#allocation3 + $0x58] sm:$0xff]  ;;  %v1137_v7 = vmov 2475754826  }
  0x15   :  { %486 = vmatpush.msra.mxu1 %v450_v8  ;;  %v81_v27 = vsub.f32 0.0, %v80_v23  ;;  %v433_v31 = vld [vmem:[#allocation3 + $0x40] sm:$0xff]  ;;  %v434_v32 = vld [vmem:[#allocation3 + $0x48] sm:$0xff]  ;;  %v431_v33 = vld [vmem:[#allocation3 + $0x30] sm:$0xff] }
  0x16   :  { %467 = vmatpush.msra.mxu0 %v447_v9  ;;  %v432_v34 = vld [vmem:[#allocation3 + $0x38] sm:$0xff]  ;;  %v429_v35 = vld [vmem:[#allocation3 + $0x20] sm:$0xff]  ;;  %v430_v36 = vld [vmem:[#allocation3 + $0x28] sm:$0xff]  ;;  %v1138_v9 = vmov 2131351028  }
  0x17   :  { %487 = vmatpush.msra.mxu1 %v448_v10  ;;  %v82_v30 = vmul.f32 1.442695, %v81_v27  ;;  %v427_v38 = vld [vmem:[#allocation3 + $0x10] sm:$0xff]  ;;  %v428_v39 = vld [vmem:[#allocation3 + $0x18] sm:$0xff]  ;;  %v509_v41 = vld [vmem:[%s1498_s1 + $0x20] sm:$0xff] }
  0x18   :  { %468 = vmatpush.msra.mxu0 %v445_v12  ;;  %1027 = vset.pattern.permute.xlu0 %v1135_v26  ;;  %v508_v40 = vld [vmem:[%s1498_s1 + $0x18] sm:$0xff]  ;;  %v425_v43 = vld [vmem:[#allocation3] sm:$0xff]  ;;  %v426_v44 = vld [vmem:[#allocation3 + $0x8] sm:$0xff] }
  0x19   :  { %488 = vmatpush.msra.mxu1 %v446_v13  ;;  %578 = vperm.xlu0 %1027, %v505_v11   ;;  %1040 = vpow2.f32 %v82_v30  ;;  %v424_v45 = vld [vmem:[%s1497_s0] sm:$0xff]  ;;  %v851_v46 = vld [vmem:[#allocation6 + $0xf8] sm:$0xff]  ;;  %v834_v50 = vld [vmem:[#allocation6 + $0x70] sm:$0xff]  ;;  %v1139_v11 = vmov 2102212464  }
  0x1a   :  { %469 = vmatpush.msra.mxu0 %v443_v15  ;;  %1029 = vset.pattern.permute.xlu1 %v1135_v26  ;;  %v835_v48 = vld [vmem:[#allocation6 + $0x78] sm:$0xff]  ;;  %v850_v51 = vld [vmem:[#allocation6 + $0xf0] sm:$0xff]  ;;  %v833_v54 = vld [vmem:[#allocation6 + $0x68] sm:$0xff] }
  0x1b   :  { %489 = vmatpush.msra.mxu1 %v444_v16  ;;  %582 = vperm.xlu1 %1029, %v506_v14   ;;  %v1247_v53 = vld [vmem:[%s1498_s1 + $0x30] sm:$0xff]  ;;  %v849_v55 = vld [vmem:[#allocation6 + $0xe8] sm:$0xff]  ;;  %v832_v57 = vld [vmem:[#allocation6 + $0x60] sm:$0xff] }
  0x1c   :  { %470 = vmatpush.msra.mxu0 %v441_v17  ;;  %1031 = vset.pattern.permute.xlu2 %v1135_v26  ;;  %v848_v58 = vld [vmem:[#allocation6 + $0xe0] sm:$0xff]  ;;  %v831_v59 = vld [vmem:[#allocation6 + $0x58] sm:$0xff]  ;;  %v510_v1 = vld [vmem:[%s1498_s1 + $0x28] sm:$0xff]  ;;  %v1140_v17 = vmov 920167782  }
  0x1d   :  { %490 = vmatpush.msra.mxu1 %v442_v18  ;;  %586 = vperm.xlu2 %1031, %v507_v19   ;;  %v847_v61 = vld [vmem:[#allocation6 + $0xd8] sm:$0xff] }
  0x1e   :  { %471 = vmatpush.msra.mxu0 %v439_v21  ;;  %995 = vmatpush.msra.mxu3 %v851_v46 }
  0x1f   :  { %491 = vmatpush.msra.mxu1 %v440_v22  ;;  %v1041_v37 = vpop.eup %1040  ;;  %979 = vmatpush.msra.mxu2 %v835_v48 }
  0x20   :  { %472 = vmatpush.msra.mxu0 %v437_v24  ;;  %v1237_v42 = vmul.f32 1.5707964, %v1041_v37  ;;  %996 = vmatpush.msra.mxu3 %v850_v51  ;;  %v1141_v24 = vmov 1326507024  }
  0x21   :  { %492 = vmatpush.msra.mxu1 %v438_v25  ;;  %1033 = vset.pattern.permute.xlu0 %v1134_v0 }
  0x22   :  { %473 = vmatpush.msra.mxu0 %v435_v28  ;;  %536 = vperm.xlu0 %1033, %v509_v41   ;;  %v88_v47 = vand.u32 2139095040, %v1237_v42  ;;  %v85_v62 = vand.u32 2147483647, %v1237_v42  ;;  %vm87_vm12 = vcmp.lt.s32.totalorder %v1237_v42, 0 }
  0x23   :  { %493 = vmatpush.msra.mxu1 %v436_v29  ;;  %1032 = vset.pattern.permute.xlu1 %v1134_v0 }
  0x24   :  { %474 = vmatpush.msra.mxu0 %v433_v31  ;;  %531 = vperm.xlu1 %1032, %v508_v40   ;;  %v89_v49 = vshrl.u32 %v88_v47, 23  ;;  %v92_v2 = vand.u32 8388607, %v85_v62  ;;  %vm1326_vm13 = vcmp.le.f32.partialorder %v85_v62, 0.7853982  ;;  %v840_v62 = vld [vmem:[#allocation6 + $0xa0] sm:$0xff] }
  0x25   :  { %494 = vmatpush.msra.mxu1 %v434_v32  ;;  %590 = vperm.xlu2 %1031, %v508_v40  }
  0x26   :  { %475 = vmatpush.msra.mxu0 %v431_v33  ;;  %v973_v52 = vadd.s32 4294967169, %v89_v49  ;;  %997 = vmatpush.msra.mxu3 %v849_v55  ;;  %v93_v13 = vor.u32 8388608, %v92_v2 }
  0x27   :  { %495 = vmatpush.msra.mxu1 %v432_v34  ;;  %980 = vmatpush.msra.mxu2 %v834_v50 }
  0x28   :  { %476 = vmatpush.msra.mxu0 %v429_v35  ;;  %v95_v56 = vadd.s32 1, %v973_v52  ;;  %998 = vmatpush.msra.mxu3 %v848_v58  ;;  %v1275_v28 = vshll.u32 %v93_v13, 8 }
  0x29   :  { %496 = vmatpush.msra.mxu1 %v430_v36  ;;  %981 = vmatpush.msra.mxu2 %v833_v54 }
  0x2a   :  { %477 = vmatpush.msra.mxu0 %v427_v38  ;;  %1036 = vset.pattern.permute.xlu0 %v1135_v26  ;;  %vm96_vm0 = vcmp.gt.s32.totalorder %v95_v56, 0  ;;  %v134_v33 = vand.u32 65535, %v1275_v28  ;;  %v135_v36 = vshrl.u32 %v1275_v28, 16 }
  0x2b   :  { %497 = vmatpush.msra.mxu1 %v428_v39  ;;  %602 = vperm.xlu0 %1036, %v1247_v53   ;;  %v97_v60 = vsel %vm96_vm0, %v95_v56, 0 }
  0x2c   :  { %478 = vmatpush.msra.mxu0 %v425_v43  ;;  %1034 = vset.pattern.permute.xlu1 %v1135_v26  ;;  %v99_v63 = vand.u32 31, %v97_v60  ;;  %v1259_v3 = vshrl.u32 %v97_v60, 5 }
  0x2d   :  { %498 = vmatpush.msra.mxu1 %v426_v44  ;;  %479 = vmatmul.f32.vlgmr.msra.gmra.mxu0 %v424_v45 }
  0x2e   :  { %499 = vmatmul.f32.vlgmr.msra.gmra.mxu1 %v424_v45  ;;  %856 = vmatpush.msrb.mxu0 %v835_v48  ;;  %v1261_v4 = vsub.s32 32, %v99_v63  ;;  %v102_v6 = vshll.u32 %v1136_v5, %v99_v63  ;;  %v105_v8 = vshll.u32 %v1137_v7, %v99_v63  ;;  %v108_v10 = vshll.u32 %v1138_v9, %v99_v63 }
  0x2f   :  { %900 = vmatpush.msrb.mxu1 %v851_v46  ;;  %594 = vperm.xlu1 %1034, %v509_v41   ;;  %v111_v12 = vshll.u32 %v1139_v11, %v99_v63  ;;  %v114_v19 = vshll.u32 %v1140_v17, %v99_v63  ;;  %vm117_vm1 = vcmp.lt.s32.totalorder %v1259_v3, 1  ;;  %vm119_vm2 = vcmp.lt.s32.totalorder %v1259_v3, 3  ;;  %v512_v41 = vld [vmem:[%s1498_s1 + $0x38] sm:$0xff] }
  0x30   :  { %857 = vmatpush.msrb.mxu0 %v834_v50  ;;  %1035 = vset.pattern.permute.xlu2 %v1134_v0  ;;  %v103_v14 = vshrl.u32 %v1137_v7, %v1261_v4  ;;  %v106_v15 = vshrl.u32 %v1138_v9, %v1261_v4  ;;  %v109_v16 = vshrl.u32 %v1139_v11, %v1261_v4  ;;  %vm120_vm3 = vcmp.lt.s32.totalorder %v1259_v3, 4 }
  0x31   :  { %901 = vmatpush.msrb.mxu1 %v850_v51  ;;  %541 = vperm.xlu2 %1035, %v510_v1   ;;  %v112_v18 = vshrl.u32 %v1140_v17, %v1261_v4  ;;  %v115_v25 = vshrl.u32 %v1141_v24, %v1261_v4  ;;  %vm118_vm4 = vcmp.lt.s32.totalorder %v1259_v3, 2 }
  0x32   :  { %858 = vmatpush.msrb.mxu0 %v833_v54  ;;  %999 = vmatpush.msra.mxu3 %v847_v61  ;;  %v104_v20 = vor.u32 %v103_v14, %v102_v6  ;;  %v107_v21 = vor.u32 %v106_v15, %v105_v8  ;;  %v110_v22 = vor.u32 %v109_v16, %v108_v10 }
  0x33   :  { %902 = vmatpush.msrb.mxu1 %v849_v55  ;;  %v113_v23 = vor.u32 %v112_v18, %v111_v12  ;;  %982 = vmatpush.msra.mxu2 %v832_v57  ;;  %v116_v29 = vor.u32 %v115_v25, %v114_v19 }
  0x34   :  { %859 = vmatpush.msrb.mxu0 %v832_v57  ;;  %v125_v27 = vsel %vm117_vm1, %v104_v20, %v107_v21  ;;  %v129_v32 = vsel %vm117_vm1, %v107_v21, %v110_v22  ;;  %v122_v6 = vsel %vm120_vm3, %v110_v22, 2102212464 }
  0x35   :  { %903 = vmatpush.msrb.mxu1 %v848_v58  ;;  %v126_v30 = vsel %vm120_vm3, %v113_v23, 920167782  ;;  %983 = vmatpush.msra.mxu2 %v831_v59  ;;  %v130_v35 = vsel %vm120_vm3, %v116_v29, 1326507024  ;;  %v123_v8 = vsel %vm119_vm2, %v107_v21, %v122_v6  ;;  %vm228_vm3 = vweird.f32 %v1237_v42 }
  0x36   :  { %860 = vmatpush.msrb.mxu0 %v831_v59  ;;  %v127_v31 = vsel %vm119_vm2, %v110_v22, %v126_v30  ;;  %v131_v37 = vsel %vm119_vm2, %v113_v23, %v130_v35 }
  0x37   :  { %904 = vmatpush.msrb.mxu1 %v847_v61  ;;  %598 = vperm.xlu1 %1034, %v510_v1   ;;  %v128_v34 = vsel %vm118_vm4, %v125_v27, %v127_v31  ;;  %v132_v40 = vsel %vm118_vm4, %v129_v32, %v131_v37  ;;  %v101_v61 = vshrl.u32 %v1136_v5, %v1261_v4  ;;  %v830_v37 = vld [vmem:[#allocation6 + $0x50] sm:$0xff] }
  0x38   :  { %v158_v38 = vand.u32 65535, %v128_v34  ;;  %v159_v39 = vshrl.u32 %v128_v34, 16  ;;  %v136_v43 = vand.u32 65535, %v132_v40  ;;  %v137_v44 = vshrl.u32 %v132_v40, 16  ;;  %861 = vmatpush.msrb.mxu0 %v830_v37  ;;  %984 = vmatpush.msra.mxu2 %v830_v37 }
  0x39   :  { %546 = vperm.xlu2 %1035, %v1247_v53  }
  0x3a   :  { %v161_v45 = vmul.u32 %v159_v39, %v134_v33  ;;  %v160_v46 = vmul.u32 %v158_v38, %v134_v33  ;;  %v162_v47 = vmul.u32 %v158_v38, %v135_v36  ;;  %v138_v48 = vmul.u32 %v136_v43, %v134_v33  ;;  %v846_v38 = vld [vmem:[#allocation6 + $0xd0] sm:$0xff] }
  0x3b   :  { %v139_v49 = vmul.u32 %v137_v44, %v134_v33  ;;  %v140_v50 = vmul.u32 %v136_v43, %v135_v36  ;;  %v163_v51 = vmul.u32 %v159_v39, %v135_v36  ;;  %v141_v53 = vmul.u32 %v137_v44, %v135_v36  ;;  %v829_v39 = vld [vmem:[#allocation6 + $0x48] sm:$0xff]  ;;  %905 = vmatpush.msrb.mxu1 %v846_v38 }
  0x3c   :  { %v164_v52 = vshll.u32 %v161_v45, 16  ;;  %v166_v56 = vshll.u32 %v162_v47, 16  ;;  %v165_v59 = vshrl.u32 %v161_v45, 16  ;;  %v167_v11 = vshrl.u32 %v162_v47, 16  ;;  %v845_v44 = vld [vmem:[#allocation6 + $0xc8] sm:$0xff]  ;;  %v844_v47 = vld [vmem:[#allocation6 + $0xc0] sm:$0xff]  ;;  %1000 = vmatpush.msra.mxu3 %v846_v38  ;;  %862 = vmatpush.msrb.mxu0 %v829_v39 }
  0x3d   :  { %v142_v54 = vshll.u32 %v139_v49, 16  ;;  %v144_v55 = vshll.u32 %v140_v50, 16  ;;  %v143_v63 = vshrl.u32 %v139_v49, 16  ;;  %v145_v5 = vshrl.u32 %v140_v50, 16  ;;  %906 = vmatpush.msrb.mxu1 %v845_v44  ;;  %v827_v50 = vld [vmem:[#allocation6 + $0x38] sm:$0xff]  ;;  %985 = vmatpush.msra.mxu2 %v829_v39 }
  0x3e   :  { %vm168_vm5 = vc.u32 %v160_v46, %v164_v52  ;;  %v170_v57 = vadd.s32 %v164_v52, %v160_v46  ;;  %v828_v46 = vld [vmem:[#allocation6 + $0x40] sm:$0xff]  ;;  %1001 = vmatpush.msra.mxu3 %v845_v44 }
  0x3f   :  { %1037 = vset.pattern.permute.xlu1 %v1134_v0  ;;  %vm146_vm6 = vc.u32 %v138_v48, %v142_v54  ;;  %v148_v58 = vadd.s32 %v142_v54, %v138_v48  ;;  %v169_v60 = vsel %vm168_vm5, 1, %v1134_v0  ;;  %863 = vmatpush.msrb.mxu0 %v828_v46 }
  0x40   :  { %551 = vperm.xlu1 %1037, %v512_v41   ;;  %v147_v1 = vsel %vm146_vm6, 1, %v1134_v0  ;;  %v171_v2 = vadd.s32 %v169_v60, %v163_v51  ;;  %vm172_vm8 = vc.u32 %v170_v57, %v166_v56  ;;  %v174_v15 = vadd.s32 %v170_v57, %v166_v56  ;;  %v843_v51 = vld [vmem:[#allocation6 + $0xb8] sm:$0xff]  ;;  %907 = vmatpush.msrb.mxu1 %v844_v47 }
  0x41   :  { %1038 = vset.pattern.permute.xlu2 %v1135_v26  ;;  %v149_v7 = vadd.s32 %v147_v1, %v141_v53  ;;  %vm150_vm7 = vc.u32 %v148_v58, %v144_v55  ;;  %v121_v26 = vsel %vm117_vm1, %v101_v61, %v104_v20  ;;  %v173_v4 = vsel %vm172_vm8, 1, %v1134_v0  ;;  %v71_v20 = vld [vmem:[%s1499_s2] sm:$0x3]  ;;  %1002 = vmatpush.msra.mxu3 %v844_v47  ;;  %v826_v61 = vld [vmem:[#allocation6 + $0x30] sm:$0xff]  ;;  %v825_v1 = vld [vmem:[#allocation6 + $0x28] sm:$0xff] }
  0x42   :  { %606 = vperm.xlu2 %1038, %v512_v41   ;;  %v151_v9 = vsel %vm150_vm7, 1, %v1134_v0  ;;  %v175_v12 = vadd.s32 %v173_v4, %v171_v2  ;;  %v124_v13 = vsel %vm118_vm4, %v121_v26, %v123_v8  ;;  %v73_v21 = vand.u32 2147483647, %v71_v20  ;;  %986 = vmatpush.msra.mxu2 %v828_v46  ;;  %v824_v8 = vld [vmem:[#allocation6 + $0x20] sm:$0xff] }
  0x43   :  { %v153_v10 = vadd.s32 %v151_v9, %v149_v7  ;;  %v178_v19 = vmul.u32 %v1275_v28, %v124_v13  ;;  %864 = vmatpush.msrb.mxu0 %v827_v50  ;;  %908 = vmatpush.msrb.mxu1 %v843_v51  ;;  %v841_v7 = vld [vmem:[#allocation6 + $0xa8] sm:$0xff]  ;;  %v838_v13 = vld [vmem:[#allocation6 + $0x90] sm:$0xff]  ;;  %v513_v46 = vld [vmem:[%s1502_s5] sm:$0xf] }
  0x44   :  { %v176_v16 = vadd.s32 %v175_v12, %v165_v59  ;;  %v74_v25 = vsub.f32 0.0, %v73_v21  ;;  %1003 = vmatpush.msra.mxu3 %v843_v51  ;;  %987 = vmatpush.msra.mxu2 %v827_v50  ;;  %v822_v12 = vld [vmem:[#allocation6 + $0x10] sm:$0xff]  ;;  %v555_v51 = vperm.slane %v513_v46, 0 }
  0x45   :  { %v154_v14 = vadd.s32 %v153_v10, %v143_v63  ;;  %v842_v63 = vld [vmem:[#allocation6 + $0xb0] sm:$0xff]  ;;  %865 = vmatpush.msrb.mxu0 %v826_v61  ;;  %v839_v10 = vld [vmem:[#allocation6 + $0x98] sm:$0xff] }
  0x46   :  { %v177_v18 = vadd.s32 %v176_v16, %v167_v11  ;;  %v75_v29 = vmul.f32 1.442695, %v74_v25  ;;  %909 = vmatpush.msrb.mxu1 %v842_v63  ;;  %1004 = vmatpush.msra.mxu3 %v842_v63  ;;  %v821_v25 = vld [vmem:[#allocation6 + $0x8] sm:$0xff] }
  0x47   :  { %v155_v17 = vadd.s32 %v154_v14, %v145_v5  ;;  %988 = vmatpush.msra.mxu2 %v826_v61  ;;  %866 = vmatpush.msrb.mxu0 %v825_v1  ;;  %v823_v5 = vld [vmem:[#allocation6 + $0x18] sm:$0xff] }
  0x48   :  { %v181_v0 = vadd.s32 1, %v177_v18  ;;  %1042 = vpow2.f32 %v75_v29  ;;  %910 = vmatpush.msrb.mxu1 %v841_v7  ;;  %1005 = vmatpush.msra.mxu3 %v841_v7 }
  0x49   :  { %vm180_vm9 = vc.u32 %v155_v17, %v174_v15  ;;  %v179_v35 = vadd.s32 %v174_v15, %v155_v17  ;;  %989 = vmatpush.msra.mxu2 %v825_v1  ;;  %867 = vmatpush.msrb.mxu0 %v824_v8 }
  0x4a   :  { %v182_v22 = vsel %vm180_vm9, %v181_v0, %v177_v18  ;;  %911 = vmatpush.msrb.mxu1 %v840_v62  ;;  %1006 = vmatpush.msra.mxu3 %v840_v62 }
  0x4b   :  { %v183_v23 = vadd.s32 %v182_v22, %v178_v19  ;;  %990 = vmatpush.msra.mxu2 %v824_v8  ;;  %868 = vmatpush.msrb.mxu0 %v823_v5 }
  0x4c   :  { %912 = vmatpush.msrb.mxu1 %v839_v10  ;;  %1007 = vmatpush.msra.mxu3 %v839_v10 }
  0x4d   :  { %v184_v24 = vadd.s32 536870912, %v183_v23  ;;  %991 = vmatpush.msra.mxu2 %v823_v5  ;;  %869 = vmatpush.msrb.mxu0 %v822_v12 }
  0x4e   :  { %v1320_v34 = vpop.eup %1042  ;;  %913 = vmatpush.msrb.mxu1 %v838_v13  ;;  %1008 = vmatpush.msra.mxu3 %v838_v13 }
  0x4f   :  { %v1317_v3 = vshrl.u32 %v184_v24, 30  ;;  %v398_v45 = vmul.f32 -2.0, %v1320_v34  ;;  %992 = vmatpush.msra.mxu2 %v822_v12  ;;  %870 = vmatpush.msrb.mxu0 %v821_v25  ;;  %v240_v12 = vld [vmem:[%s1501_s4] sm:$0x3] }
  0x51   :  { %v186_v27 = vshll.u32 %v1317_v3, 30  ;;  %v399_v54 = vmul.f32 1.442695, %v398_v45  ;;  %v209_v18 = vsub.s32 4, %v1317_v3  ;;  %993 = vmatpush.msra.mxu2 %v821_v25 }
  0x53   :  { %v187_v30 = vsub.s32 %v183_v23, %v186_v27  ;;  %1044 = vpow2.f32 %v399_v54  ;;  %v210_v22 = vsel %vm87_vm12, %v209_v18, %v1317_v3  ;;  %v837_v27 = vld [vmem:[#allocation6 + $0x88] sm:$0xff]  ;;  %v610_v54 = vperm.slane %v513_v46, 3 }
  0x54   :  { %v212_v29 = vsel %vm1326_vm13, 0, %v210_v22  ;;  %914 = vmatpush.msrb.mxu1 %v837_v27  ;;  %1009 = vmatpush.msra.mxu3 %v837_v27 }
  0x55   :  { %vm188_vm10 = vcmp.lt.s32.totalorder %v187_v30, 0  ;;  %v189_v31 = vsub.s32 0, %v187_v30  ;;  %v229_v45 = vand.u32 3, %v212_v29  ;;  %v1361_v7 = vperm.slane %v610_v54, 1 }
  0x57   :  { %v190_v28 = vsel %vm188_vm10, %v189_v31, %v187_v30  ;;  %v820_v31 = vld [vmem:[#allocation6] sm:$0xff]  ;;  %vm231_vm1 = vcmp.eq.s32.totalorder %v229_v45, 0  ;;  %vm234_vm2 = vcmp.eq.s32.totalorder %v229_v45, 2  ;;  %vm230_vm5 = vcmp.lt.s32.totalorder %v229_v45, 2 }
  0x58   :  { %v191_v32 = vclz %v190_v28  ;;  %v836_v28 = vld [vmem:[#allocation6 + $0x80] sm:$0xff]  ;;  %871 = vmatpush.msrb.mxu0 %v820_v31  ;;  %994 = vmatpush.msra.mxu2 %v820_v31 }
  0x59   :  { %v1045_v6 = vpop.eup %1044  ;;  %915 = vmatpush.msrb.mxu1 %v836_v28  ;;  %1010 = vmatpush.msra.mxu3 %v836_v28 }
  0x5a   :  { %v974_v33 = vadd.s32 4294967294, %v191_v32  ;;  %v1335_v4 = vsub.f32 1.0, %v1045_v6 }
  0x5c   :  { %vm975_vm11 = vcmp.lt.s32.totalorder %v974_v33, 0  ;;  %1046 = vrsqrt.f32 %v1335_v4  ;;  %vm409_vm4 = vcmp.eq.f32.partialorder %v1335_v4, inf  ;;  %vm411_vm6 = vcmp.eq.f32.partialorder %v1335_v4, 0.0 }
  0x5d   :  { %v194_v36 = vsel %vm975_vm11, 0, %v974_v33 }
  0x5e   :  { %v195_v40 = vsub.s32 32, %v194_v36  ;;  %v196_v41 = vshll.u32 %v187_v30, %v194_v36  ;;  %v199_v43 = vsub.s32 4294967266, %v194_v36  ;;  %v77_v36 = vsub.f32 0.0, %v1320_v34 }
  0x60   :  { %v197_v48 = vshrl.u32 %v179_v35, %v195_v40  ;;  %v200_v49 = vadd.s32 127, %v199_v43  ;;  %v385_v35 = vadd.s32 3, %v212_v29 }
  0x62   :  { %v198_v52 = vor.u32 %v197_v48, %v196_v41  ;;  %v201_v53 = vshll.u32 %v200_v49, 23  ;;  %v1047_v19 = vpop.eup %1046  ;;  %v386_v39 = vand.u32 3, %v385_v35  ;;  %v78_v41 = vmul.f32 1.442695, %v77_v36 }
  0x63   :  { %v403_v21 = vmul.f32 %v1047_v19, %v1335_v4 }
  0x64   :  { %v202_v55 = vor.u32 4788187, %v201_v53  ;;  %v205_v56 = vcvt.s32.f32 %v198_v52  ;;  %vm388_vm14 = vcmp.eq.s32.totalorder %v386_v39, 0  ;;  %vm391_vm15 = vcmp.eq.s32.totalorder %v386_v39, 2 }
  0x65   :  { %v404_v30 = vmul.f32 %v1047_v19, %v403_v21  ;;  %1048 = vpow2.f32 %v78_v41  ;;  %vm387_vm0 = vcmp.lt.s32.totalorder %v386_v39, 2  ;;  %v556_v52 = vperm.slane %v513_v46, 2 }
  0x66   :  { %v203_v57 = vand.u32 2147483647, %v202_v55  ;;  %v609_v53 = vperm.slane %v513_v46, 1 }
  0x67   :  { %v405_v3 = vmul.f32 0.5, %v404_v30  ;;  %v1354_v63 = vperm.slane %v556_v52, 0 }
  0x68   :  { %v206_v58 = vmul.f32 %v205_v56, %v203_v57  ;;  %v1356_v1 = vperm.slane %v609_v53, 1 }
  0x69   :  { %v406_v40 = vsub.f32 1.5, %v405_v3 }
  0x6a   :  { %v207_v60 = vxor.u32 2147483648, %v206_v58 }
  0x6b   :  { %v407_v49 = vmul.f32 %v1047_v19, %v406_v40  ;;  %v1049_v61 = vpop.eup %1048 }
  0x6c   :  { %v208_v2 = vsel %vm87_vm12, %v207_v60, %v206_v58  ;;  %v1352_v60 = vperm.slane %v555_v51, 0 }
  0x6d   :  { %v211_v26 = vsel %vm1326_vm13, %v1237_v42, %v208_v2  ;;  %v408_v55 = vmul.f32 %v407_v49, %v1335_v4  ;;  %v527_v56 = vpop.permute.xlu2 %526  ;;  %v412_v2 = vand.u32 2147483648, %v1335_v4 }
  0x6e   :  { %v213_v9 = vmul.f32 %v211_v26, %v211_v26  ;;  %v565_v3 = vmul.f32 %v1352_v60, %v527_v56  ;;  %v566_v36 = vmul.f32 %v1354_v63, %v527_v56 }
  0x70   :  { %v221_v11 = vmul.f32 -0.00019511016, %v213_v9  ;;  %v214_v14 = vmul.f32 -0.001358992, %v213_v9 }
  0x72   :  { %v222_v15 = vadd.f32 0.008332121, %v221_v11  ;;  %v215_v16 = vadd.f32 0.041655596, %v214_v14 }
  0x74   :  { %v223_v17 = vmul.f32 %v222_v15, %v213_v9  ;;  %v216_v20 = vmul.f32 %v215_v16, %v213_v9  ;;  %v457_v16 = vld [vmem:[%s1505_s8] sm:$0x3] }
  0x76   :  { %v224_v0 = vadd.f32 -0.16666654, %v223_v17  ;;  %v217_v23 = vadd.f32 -0.4999988, %v216_v20  ;;  %v459_v20 = vperm.slane %v457_v16, 0 }
  0x77   :  { %v587_v42 = vpop.permute.xlu2 %586 }
  0x78   :  { %v225_v24 = vmul.f32 %v224_v0, %v213_v9  ;;  %v218_v32 = vmul.f32 %v217_v23, %v213_v9  ;;  %v460_v23 = vperm.slane %v457_v16, 1  ;;  %v620_v49 = vmul.f32 %v1361_v7, %v587_v42 }
  0x7a   :  { %v226_v33 = vadd.f32 1.0, %v225_v24  ;;  %v219_v37 = vadd.f32 1.0, %v218_v32  ;;  %v668_v24 = vld [vmem:[%s1503_s6] sm:$0x3] }
  0x7b   :  { %v1398_v39 = vperm.slane %v668_v24, 0  ;;  %v1400_v40 = vperm.slane %v668_v24, 1 }
  0x7c   :  { %v227_v38 = vmul.f32 %v226_v33, %v211_v26  ;;  %v235_v44 = vxor.u32 2147483648, %v219_v37  ;;  %v410_v26 = vsel %vm409_vm4, %v1335_v4, %v408_v55 }
  0x7d   :  { %v413_v10 = vsel %vm411_vm6, %v412_v2, %v410_v26 }
  0x7e   :  { %v232_v43 = vxor.u32 2147483648, %v227_v38  ;;  %v393_v50 = vsel %vm391_vm15, %v235_v44, %v227_v38  ;;  %v236_v59 = vsel %vm234_vm2, %v235_v44, %v227_v38  ;;  %v1377_v19 = vperm.slane %v413_v10, 0 }
  0x7f   :  { %v1379_v22 = vperm.slane %v413_v10, 1  ;;  %v591_v53 = vpop.permute.xlu2 %590 }
  0x80   :  { %v390_v34 = vsel %vm388_vm14, %v219_v37, %v232_v43  ;;  %v233_v58 = vsel %vm231_vm1, %v219_v37, %v232_v43 }
  0x81   :  { %v394_v57 = vsel %vm387_vm0, %v390_v34, %v393_v50  ;;  %v237_v8 = vsel %vm230_vm5, %v233_v58, %v236_v59  ;;  %v636_v59 = vadd.f32 %v620_v49, %v566_v36 }
  0x82   :  { %v517_v47 = vpop.permute.xlu0 %516  ;;  %v395_v6 = vsel %vm228_vm3, nan, %v394_v57  ;;  %v238_v11 = vsel %vm228_vm3, nan, %v237_v8  ;;  %v621_v8 = vmul.f32 %v1356_v1, %v591_v53 }
  0x83   :  { %v396_v5 = vmul.f32 %v1049_v61, %v395_v6  ;;  %v561_v13 = vmul.f32 %v1352_v60, %v517_v47  ;;  %v562_v14 = vmul.f32 %v1354_v63, %v517_v47  ;;  %v239_v17 = vmul.f32 %v1049_v61, %v238_v11 }
  0x84   :  { %v522_v48 = vpop.permute.xlu1 %521 }
  0x85   :  { %v397_v18 = vmul.f32 %v396_v5, %v240_v12  ;;  %v563_v25 = vmul.f32 %v1352_v60, %v522_v48  ;;  %v564_v27 = vmul.f32 %v1354_v63, %v522_v48  ;;  %v1388_v31 = vperm.slane %v239_v17, 0 }
  0x86   :  { %v1392_v32 = vperm.slane %v239_v17, 1  ;;  %v619_v48 = vmul.f32 %v1356_v1, %v587_v42 }
  0x87   :  { %v1390_v28 = vperm.slane %v397_v18, 1  ;;  %v1394_v33 = vperm.slane %v397_v18, 0 }
  0x88   :  { %v635_v58 = vadd.f32 %v619_v48, %v565_v3 }
  0x8a   :  { %v656_v42 = vmul.f32 %v1377_v19, %v635_v58 }
  0x8b   :  { %v579_v62 = vpop.permute.xlu0 %578 }
  0x8c   :  { %v615_v15 = vmul.f32 %v1356_v1, %v579_v62  ;;  %v616_v4 = vmul.f32 %v1361_v7, %v579_v62  ;;  %v622_v62 = vmul.f32 %v1361_v7, %v591_v53 }
  0x8d   :  { %v583_v9 = vpop.permute.xlu1 %582 }
  0x8e   :  { %v631_v0 = vadd.f32 %v615_v15, %v561_v13  ;;  %v632_v21 = vadd.f32 %v616_v4, %v562_v14  ;;  %v617_v29 = vmul.f32 %v1356_v1, %v583_v9  ;;  %v618_v30 = vmul.f32 %v1361_v7, %v583_v9 }
  0x90   :  { %v652_v41 = vmul.f32 %v1377_v19, %v631_v0  ;;  %v653_v43 = vmul.f32 %v1379_v22, %v632_v21  ;;  %v633_v46 = vadd.f32 %v617_v29, %v563_v25  ;;  %v634_v47 = vadd.f32 %v618_v30, %v564_v27 }
  0x92   :  { %v674_v54 = vadd.f32 %v1398_v39, %v652_v41  ;;  %v675_v56 = vadd.f32 %v1400_v40, %v653_v43  ;;  %v654_v61 = vmul.f32 %v1377_v19, %v633_v46  ;;  %v655_v2 = vmul.f32 %v1379_v22, %v634_v47 }
  0x94   :  { %v677_v15 = vadd.f32 %v1400_v40, %v655_v2  ;;  %v676_v16 = vadd.f32 %v1398_v39, %v654_v61  ;;  %v537_v18 = vpop.permute.xlu0 %536 }
  0x95   :  { %v569_v29 = vmul.f32 %v1352_v60, %v537_v18  ;;  %v570_v30 = vmul.f32 %v1354_v63, %v537_v18 }
  0x96   :  { %v532_v35 = vpop.permute.xlu1 %531 }
  0x97   :  { %v567_v9 = vmul.f32 %v1352_v60, %v532_v35  ;;  %v568_v5 = vmul.f32 %v1354_v63, %v532_v35 }
  0x99   :  { %v637_v0 = vadd.f32 %v621_v8, %v567_v9  ;;  %v638_v21 = vadd.f32 %v622_v62, %v568_v5 }
  0x9b   :  { %v658_v48 = vmul.f32 %v1377_v19, %v637_v0  ;;  %v659_v49 = vmul.f32 %v1379_v22, %v638_v21 }
  0x9d   :  { %v681_v8 = vadd.f32 %v1400_v40, %v659_v49 }
  0xa1   :  { %v595_v12 = vpop.permute.xlu1 %594 }
  0xa2   :  { %v623_v25 = vmul.f32 %v1356_v1, %v595_v12  ;;  %v624_v27 = vmul.f32 %v1361_v7, %v595_v12 }
  0xa4   :  { %v639_v46 = vadd.f32 %v623_v25, %v569_v29  ;;  %v640_v47 = vadd.f32 %v624_v27, %v570_v30 }
  0xa6   :  { %v660_v58 = vmul.f32 %v1377_v19, %v639_v46 }
  0xa8   :  { %v682_v12 = vadd.f32 %v1398_v39, %v660_v58 }
  0xaa   :  { %v480_v37 = vpop.f32.mrf.mxu0 }
  0xab   :  { %v500_v38 = vpop.f32.mrf.mxu1  ;;  %v481_v44 = vadd.f32 %v480_v37, %v459_v20  ;;  %v657_v20 = vmul.f32 %v1379_v22, %v636_v59  ;;  %v661_v59 = vmul.f32 %v1379_v22, %v640_v47 }
  0xac   :  { %v501_v45 = vadd.f32 %v500_v38, %v460_v23  ;;  %v678_v38 = vadd.f32 %v1398_v39, %v656_v42 }
  0xad   :  { %v708_v34 = vmul.f32 %v481_v44, %v1388_v31  ;;  %v711_v50 = vmul.f32 %v481_v44, %v1390_v28  ;;  %872 = vmatmul.f32.vlgmr.msrb.gmra.mxu0 %v481_v44  ;;  %v679_v43 = vadd.f32 %v1400_v40, %v657_v20 }
  0xae   :  { %v709_v51 = vmul.f32 %v501_v45, %v1392_v32  ;;  %v710_v52 = vmul.f32 %v501_v45, %v1394_v33  ;;  %916 = vmatmul.f32.vlgmr.msrb.gmra.mxu1 %v501_v45  ;;  %v542_v45 = vpop.permute.xlu2 %541 }
  0xaf   :  { %v572_v53 = vmul.f32 %v1354_v63, %v542_v45 }
  0xb0   :  { %v712_v55 = vadd.f32 %v710_v52, %v708_v34  ;;  %v713_v57 = vadd.f32 %v711_v50, %v709_v51  ;;  %v599_v51 = vpop.permute.xlu1 %598  ;;  %v571_v52 = vmul.f32 %v1352_v60, %v542_v45 }
  0xb1   :  { %v625_v61 = vmul.f32 %v1356_v1, %v599_v51  ;;  %v626_v2 = vmul.f32 %v1361_v7, %v599_v51 }
  0xb2   :  { %v714_v6 = vadd.f32 %v712_v55, %v674_v54  ;;  %v715_v26 = vadd.f32 %v713_v57, %v675_v56 }
  0xb4   :  { %v721_v10 = vmul.f32 %v715_v26, %v1392_v32  ;;  %v723_v11 = vmul.f32 %v714_v6, %v1390_v28  ;;  %v720_v13 = vmul.f32 %v714_v6, %v1388_v31  ;;  %v722_v14 = vmul.f32 %v715_v26, %v1394_v33 }
  0xb5   :  { %875 = vmatmul.f32.gmra.mxu0 %v714_v6  ;;  %v680_v6 = vadd.f32 %v1398_v39, %v658_v48 }
  0xb6   :  { %v725_v4 = vadd.f32 %v723_v11, %v721_v10  ;;  %v724_v17 = vadd.f32 %v722_v14, %v720_v13  ;;  %919 = vmatmul.f32.gmra.mxu1 %v715_v26  ;;  %v641_v10 = vadd.f32 %v625_v61, %v571_v52  ;;  %v642_v11 = vadd.f32 %v626_v2, %v572_v53  ;;  %v547_v14 = vpop.permute.xlu2 %546 }
  0xb7   :  { %v683_v13 = vadd.f32 %v1400_v40, %v661_v59  ;;  %v573_v0 = vmul.f32 %v1352_v60, %v547_v14  ;;  %v574_v21 = vmul.f32 %v1354_v63, %v547_v14 }
  0xb8   :  { %v727_v23 = vadd.f32 %v725_v4, %v677_v15  ;;  %v726_v24 = vadd.f32 %v724_v17, %v676_v16  ;;  %v603_v15 = vpop.permute.xlu0 %602  ;;  %v662_v25 = vmul.f32 %v1377_v19, %v641_v10  ;;  %v663_v27 = vmul.f32 %v1379_v22, %v642_v11 }
  0xba   :  { %922 = vmatmul.f32.vlgmr.msra.gmra.mxu3 %v727_v23  ;;  %v732_v35 = vmul.f32 %v726_v24, %v1388_v31  ;;  %v734_v3 = vmul.f32 %v727_v23, %v1394_v33  ;;  %v733_v36 = vmul.f32 %v727_v23, %v1392_v32  ;;  %v735_v37 = vmul.f32 %v726_v24, %v1390_v28 }
  0xbb   :  { %v627_v23 = vmul.f32 %v1356_v1, %v603_v15  ;;  %v685_v45 = vadd.f32 %v1400_v40, %v663_v27 }
  0xbc   :  { %v736_v41 = vadd.f32 %v734_v3, %v732_v35  ;;  %v737_v44 = vadd.f32 %v735_v37, %v733_v36 }
  0xbd   :  { %878 = vmatmul.f32.gmra.mxu0 %v726_v24  ;;  %v628_v24 = vmul.f32 %v1361_v7, %v603_v15 }
  0xbe   :  { %v738_v34 = vadd.f32 %v736_v41, %v678_v38  ;;  %v739_v50 = vadd.f32 %v737_v44, %v679_v43  ;;  %v643_v38 = vadd.f32 %v627_v23, %v573_v0  ;;  %v684_v43 = vadd.f32 %v1398_v39, %v662_v25 }
  0xbf   :  { %v644_v41 = vadd.f32 %v628_v24, %v574_v21 }
  0xc0   :  { %881 = vmatmul.f32.vlgmr.msra.gmra.mxu2 %v738_v34  ;;  %v744_v54 = vmul.f32 %v738_v34, %v1388_v31  ;;  %v746_v55 = vmul.f32 %v739_v50, %v1394_v33  ;;  %v745_v56 = vmul.f32 %v739_v50, %v1392_v32  ;;  %v747_v57 = vmul.f32 %v738_v34, %v1390_v28 }
  0xc1   :  { %v664_v49 = vmul.f32 %v1377_v19, %v643_v38  ;;  %v665_v34 = vmul.f32 %v1379_v22, %v644_v41 }
  0xc2   :  { %925 = vmatmul.f32.gmra.mxu3 %v739_v50  ;;  %v748_v26 = vadd.f32 %v746_v55, %v744_v54  ;;  %v749_v62 = vadd.f32 %v747_v57, %v745_v56  ;;  %v607_v50 = vpop.permute.xlu2 %606  ;;  %v552_v55 = vpop.permute.xlu1 %551 }
  0xc3   :  { %v629_v56 = vmul.f32 %v1356_v1, %v607_v50  ;;  %v686_v57 = vadd.f32 %v1398_v39, %v664_v49  ;;  %v575_v58 = vmul.f32 %v1352_v60, %v552_v55  ;;  %v687_v61 = vadd.f32 %v1400_v40, %v665_v34 }
  0xc4   :  { %v750_v9 = vadd.f32 %v748_v26, %v680_v6  ;;  %v751_v5 = vadd.f32 %v749_v62, %v681_v8  ;;  %v630_v6 = vmul.f32 %v1361_v7, %v607_v50  ;;  %v576_v26 = vmul.f32 %v1354_v63, %v552_v55 }
  0xc5   :  { %v645_v8 = vadd.f32 %v629_v56, %v575_v58 }
  0xc6   :  { %v756_v4 = vmul.f32 %v750_v9, %v1388_v31  ;;  %v758_v16 = vmul.f32 %v751_v5, %v1394_v33  ;;  %v757_v17 = vmul.f32 %v751_v5, %v1392_v32  ;;  %v759_v18 = vmul.f32 %v750_v9, %v1390_v28 }
  0xc7   :  { %v666_v1 = vmul.f32 %v1377_v19, %v645_v8 }
  0xc8   :  { %884 = vmatmul.f32.gmra.mxu2 %v750_v9  ;;  %v760_v42 = vadd.f32 %v758_v16, %v756_v4  ;;  %v761_v20 = vadd.f32 %v759_v18, %v757_v17 }
  0xc9   :  { %v688_v63 = vadd.f32 %v1398_v39, %v666_v1 }
  0xca   :  { %928 = vmatmul.f32.gmra.mxu3 %v751_v5  ;;  %v762_v29 = vadd.f32 %v760_v42, %v682_v12  ;;  %v763_v30 = vadd.f32 %v761_v20, %v683_v13  ;;  %v646_v5 = vadd.f32 %v630_v6, %v576_v26 }
  0xcc   :  { %v768_v35 = vmul.f32 %v762_v29, %v1388_v31  ;;  %v770_v3 = vmul.f32 %v763_v30, %v1394_v33  ;;  %v769_v36 = vmul.f32 %v763_v30, %v1392_v32  ;;  %v771_v37 = vmul.f32 %v762_v29, %v1390_v28 }
  0xcd   :  { %v667_v11 = vmul.f32 %v1379_v22, %v646_v5  ;;  %v1039_v22 = vld [vmem:[%s1507_s10] ss:$0 sm:$0xff]  ;;  %s1142_s10 = smov [#allocation8]  }
  0xce   :  { %v772_v44 = vadd.f32 %v770_v3, %v768_v35  ;;  %v773_v46 = vadd.f32 %v771_v37, %v769_v36  ;;  %s957_s15 = sshll.u32 %s1142_s10, 4  ;;  %s958_s15 = int_to_ptr.vmem [resolvable:$true] %s957_s15 }
  0xcf   :  { %v689_v14 = vadd.f32 %v1400_v40, %v667_v11 }
  0xd0   :  { %887 = vmatmul.f32.gmra.mxu2 %v762_v29  ;;  %v774_v47 = vadd.f32 %v772_v44, %v684_v43  ;;  %v775_v48 = vadd.f32 %v773_v46, %v685_v45 }
  0xd2   :  { %931 = vmatmul.f32.gmra.mxu3 %v763_v30  ;;  %v780_v51 = vmul.f32 %v774_v47, %v1388_v31  ;;  %v782_v52 = vmul.f32 %v775_v48, %v1394_v33  ;;  %v781_v53 = vmul.f32 %v775_v48, %v1392_v32  ;;  %v783_v54 = vmul.f32 %v774_v47, %v1390_v28 }
  0xd4   :  { %v784_v59 = vadd.f32 %v782_v52, %v780_v51  ;;  %v785_v2 = vadd.f32 %v783_v54, %v781_v53 }
  0xd6   :  { %v786_v62 = vadd.f32 %v784_v59, %v686_v57  ;;  %v787_v9 = vadd.f32 %v785_v2, %v687_v61 }
  0xd8   :  { %890 = vmatmul.f32.gmra.mxu2 %v774_v47  ;;  %v792_v10 = vmul.f32 %v786_v62, %v1388_v31  ;;  %v794_v60 = vmul.f32 %v787_v9, %v1394_v33  ;;  %v793_v12 = vmul.f32 %v787_v9, %v1392_v32  ;;  %v795_v7 = vmul.f32 %v786_v62, %v1390_v28 }
  0xda   :  { %934 = vmatmul.f32.gmra.mxu3 %v775_v48  ;;  %v796_v13 = vadd.f32 %v794_v60, %v792_v10  ;;  %v797_v15 = vadd.f32 %v795_v7, %v793_v12 }
  0xdc   :  { %v798_v4 = vadd.f32 %v796_v13, %v688_v63  ;;  %v799_v19 = vadd.f32 %v797_v15, %v689_v14 }
  0xe0   :  { %893 = vmatmul.f32.gmra.mxu2 %v786_v62 }
  0xe2   :  { %937 = vmatmul.f32.gmra.mxu3 %v787_v9 }
  0xe8   :  { %896 = vmatmul.f32.gmra.mxu2 %v798_v4 }
  0xea   :  { %940 = vmatmul.f32.gmra.mxu3 %v799_v19 }
 0x12a   :  { %v873_v31 = vpop.f32.mrf.mxu0 }
 0x12b   :  { %v874_v33 = vadd.f32 %v1039_v22, %v873_v31  ;;  %v917_v32 = vpop.f32.mrf.mxu1 }
 0x12d   :  { %v918_v16 = vadd.f32 %v917_v32, %v874_v33 }
 0x12f   :  { %944 = vst [vmem:[#allocation8] sm:$0xff] %v918_v16 }
 0x132   :  { %v876_v28 = vpop.f32.mrf.mxu0 }
 0x133   :  { %v877_v17 = vadd.f32 %v1039_v22, %v876_v28  ;;  %v920_v39 = vpop.f32.mrf.mxu1 }
 0x135   :  { %v921_v18 = vadd.f32 %v920_v39, %v877_v17 }
 0x137   :  { %945 = vst [vmem:[#allocation8 + $0x8] sm:$0xff] %v921_v18 }
 0x13a   :  { %v879_v40 = vpop.f32.mrf.mxu0 }
 0x13b   :  { %v880_v42 = vadd.f32 %v1039_v22, %v879_v40 }
 0x13d   :  { %v923_v20 = vpop.f32.mrf.mxu3 }
 0x13e   :  { %v924_v0 = vadd.f32 %v923_v20, %v880_v42 }
 0x140   :  { %946 = vst [vmem:[#allocation8 + $0x10] sm:$0xff] %v924_v0 }
 0x143   :  { %v882_v21 = vpop.f32.mrf.mxu2 }
 0x144   :  { %v883_v23 = vadd.f32 %v1039_v22, %v882_v21 }
 0x145   :  { %v926_v24 = vpop.f32.mrf.mxu3 }
 0x146   :  { %v927_v25 = vadd.f32 %v926_v24, %v883_v23 }
 0x148   :  { %947 = vst [vmem:[#allocation8 + $0x18] sm:$0xff] %v927_v25 }
 0x14b   :  { %v885_v27 = vpop.f32.mrf.mxu2 }
 0x14c   :  { %v886_v29 = vadd.f32 %v1039_v22, %v885_v27 }
 0x14d   :  { %v929_v30 = vpop.f32.mrf.mxu3 }
 0x14e   :  { %v930_v35 = vadd.f32 %v929_v30, %v886_v29 }
 0x150   :  { %948 = vst [vmem:[#allocation8 + $0x20] sm:$0xff] %v930_v35 }
 0x153   :  { %v888_v3 = vpop.f32.mrf.mxu2 }
 0x154   :  { %v889_v36 = vadd.f32 %v1039_v22, %v888_v3 }
 0x155   :  { %v932_v37 = vpop.f32.mrf.mxu3 }
 0x156   :  { %v933_v38 = vadd.f32 %v932_v37, %v889_v36 }
 0x158   :  { %949 = vst [vmem:[#allocation8 + $0x28] sm:$0xff] %v933_v38 }
 0x15b   :  { %v891_v41 = vpop.f32.mrf.mxu2 }
 0x15c   :  { %v892_v43 = vadd.f32 %v1039_v22, %v891_v41 }
 0x15d   :  { %v935_v44 = vpop.f32.mrf.mxu3 }
 0x15e   :  { %v936_v45 = vadd.f32 %v935_v44, %v892_v43 }
 0x160   :  { %950 = vst [vmem:[#allocation8 + $0x30] sm:$0xff] %v936_v45 }
 0x163   :  { %v894_v46 = vpop.f32.mrf.mxu2 }
 0x164   :  { %v895_v47 = vadd.f32 %v1039_v22, %v894_v46 }
 0x165   :  { %v938_v48 = vpop.f32.mrf.mxu3 }
 0x166   :  { %v939_v49 = vadd.f32 %v938_v48, %v895_v47 }
 0x168   :  { %951 = vst [vmem:[#allocation8 + $0x38] sm:$0xff] %v939_v49 }
 0x16b   :  { %v897_v34 = vpop.f32.mrf.mxu2 }
 0x16c   :  { %v898_v50 = vadd.f32 %v1039_v22, %v897_v34 }
 0x16d   :  { %v941_v51 = vpop.f32.mrf.mxu3 }
 0x16e   :  { %v942_v52 = vadd.f32 %v941_v51, %v898_v50 }
 0x170   :  { %952 = vst [vmem:[#allocation8 + $0x40] sm:$0xff] %v942_v52 }
 0x171   :  { %965 = dma.vmem_to_hbm [thread:$0]  %s958_s15, 1152, %s960_s3, [#allocation5], %s1132_s29, %s1132_s29, %s1133_s30  }
 0x172   :  { %1126 = dma.done.wait [#allocation5], 1152  }
 0x173   :  { %1127 = vsyncadd [#allocation5], 4294966144 }
 0x174   :  { %970 = vsyncpa [#allocation4], 1 }
 0x175   :  { %971 = vsyncpa [#allocation7], 1 }
 0x176   :  { %972 = vsyncpa [#allocation5], 1 }

</bundles_post_ra>
